<compile_context>
chip_gen: v5e
topology: v5e:2x2
jax: 0.10.0
libtpu: 0.0.40
codegen_flags: <defaults>
</compile_context>

<pallas_src>
import functools

import jax
import jax.numpy as jnp
from jax.experimental import pallas as pl
from jax.experimental.pallas import tpu as pltpu


# Target f32 working-set of one in-kernel row sub-chunk.  This bounds the live
# f32 copy of x regardless of how big the DMA tile is.
_SUB_F32_BYTES = 4 * 1024 * 1024


def _rms_norm_kernel(x_ref, w_ref, o_ref, *, eps, inv_hidden, sub_rows):
    # x_ref: (block_rows, hidden)   w_ref: (1, hidden) already in output dtype
    w = w_ref[...]

    def process(r0):
        x = x_ref[pl.ds(r0, sub_rows), :].astype(jnp.float32)
        # Cross-lane reduction -> XLU; fold the 1/hidden constant into the
        # rsqrt argument (a (rows, 1) scale) instead of a full-tile mean pass.
        ss = jnp.sum(x * x, axis=-1, keepdims=True)
        inv = jax.lax.rsqrt(ss * inv_hidden + eps)  # EUP rsqrt, off the VALU
        # HF ordering: cast back to the activation dtype, then scale by weight.
        o_ref[pl.ds(r0, sub_rows), :] = w * (x * inv).astype(o_ref.dtype)

    n_sub = x_ref.shape[0] // sub_rows
    if n_sub == 1:
        process(0)
    else:
        # In-kernel loop bounds the f32 live range to one sub-chunk.
        @pl.loop(0, n_sub)
        def _(s):
            process(pl.multiple_of(s * sub_rows, sub_rows))


def _sublane_pack(dtype):
    # Rows packed per vreg sublane group: 8 (f32), 16 (bf16), 32 (int8/fp8).
    itemsize = jnp.dtype(dtype).itemsize
    return max(8, 32 // max(1, itemsize))


def _vmem_capacity_bytes():
    try:
        info = pltpu.get_tpu_info()
        cap = getattr(info, "vmem_capacity_bytes", None)
        if cap:
            return int(cap)
    except Exception:
        pass
    # Per-generation fallback (AOT / mock compiles where get_tpu_info fails):
    # v7x has 64 MiB per TensorCore; v4/v5e/v6e have 128 MiB.
    try:
        kind = jax.devices()[0].device_kind.lower()
        if "v7" in kind:
            return 64 * 1024 * 1024
        return 128 * 1024 * 1024
    except Exception:
        return 64 * 1024 * 1024  # truly unknown: stay conservative


def _select_tiling(rows, hidden, dtype, block_rows=None):
    """Return (block_rows, sub_rows); block_rows is a multiple of sub_rows."""
    itemsize = jnp.dtype(dtype).itemsize
    pack = _sublane_pack(dtype)
    rows_p = pl.cdiv(rows, pack) * pack

    # In-kernel f32 sub-chunk: <= ~_SUB_F32_BYTES and <= 1024 rows.
    sub_rows = max(pack, min(1024, (_SUB_F32_BYTES // (4 * hidden)) // pack * pack))

    if block_rows is None:
        vmem = _vmem_capacity_bytes()
        # Per-row live VMEM: double-buffered input + output tiles in the
        # activation dtype.  The f32 working set is a fixed bounded cost.
        per_row = hidden * itemsize * 4
        budget = int(vmem * 0.5) - 2 * sub_rows * hidden * 4
        max_block = max(pack, (budget // per_row) // pack * pack)
        # Target >= 4 grid steps when there is enough work: 2 balanced steps
        # per TensorCore on v7x (megacore) and pipelining everywhere.
        if rows_p >= 4 * pack:
            min_steps = 4
        elif rows_p >= 2 * pack:
            min_steps = 2
        else:
            min_steps = 1
        step_cap = pl.cdiv(pl.cdiv(rows_p, min_steps), pack) * pack
        block_rows = min(max_block, rows_p, step_cap)

    block_rows = max(pack, (block_rows // pack) * pack)
    sub_rows = min(sub_rows, block_rows)
    block_rows = max(sub_rows, (block_rows // sub_rows) * sub_rows)
    return block_rows, sub_rows


def rms_norm(hidden_states, weight, eps=1e-6, *, block_rows=None):
    """Pallas RMSNorm. hidden_states: (..., hidden); weight: (hidden,)."""
    orig_shape = hidden_states.shape
    hidden = orig_shape[-1]
    dtype = hidden_states.dtype
    itemsize = jnp.dtype(dtype).itemsize

    x2d = hidden_states.reshape(-1, hidden)
    rows = x2d.shape[0]

    block_rows, sub_rows = _select_tiling(rows, hidden, dtype, block_rows)
    grid = pl.cdiv(rows, block_rows)  # ragged last block handled by Pallas

    # Pre-cast the weight once outside the kernel; HF multiplies the weight
    # against activations already cast back to the input dtype.  (For bf16
    # activations the eager torch path would promote to f32; we stay in the
    # activation dtype like the fused kernel path.)
    w2d = weight.astype(dtype).reshape(1, hidden)

    # Scoped VMEM: double-buffered in/out tiles + bounded f32 sub-chunk +
    # weight, with ~20% headroom; never exceed (most of) the physical VMEM.
    tile_bytes = block_rows * hidden * itemsize
    f32_bytes = 2 * sub_rows * hidden * 4
    vmem_limit = int((4 * tile_bytes + f32_bytes + 2 * hidden * itemsize) * 1.2)
    vmem_limit = max(vmem_limit, 16 * 1024 * 1024)
    vmem_limit = min(vmem_limit, int(_vmem_capacity_bytes() * 0.9))

    cost = pl.CostEstimate(
        flops=4 * rows * hidden,
        transcendentals=rows,
        bytes_accessed=2 * rows * hidden * itemsize + hidden * itemsize,
    )

    out = pl.pallas_call(
        functools.partial(
            _rms_norm_kernel, eps=eps, inv_hidden=1.0 / hidden, sub_rows=sub_rows
        ),
        out_shape=jax.ShapeDtypeStruct((rows, hidden), dtype),
        grid_spec=pltpu.PrefetchScalarGridSpec(
            num_scalar_prefetch=0,
            grid=(grid,),
            in_specs=[
                pl.BlockSpec((block_rows, hidden), lambda i: (i, 0)),
                pl.BlockSpec((1, hidden), lambda i: (0, 0)),
            ],
            out_specs=pl.BlockSpec((block_rows, hidden), lambda i: (i, 0)),
        ),
        compiler_params=pltpu.CompilerParams(
            dimension_semantics=("parallel",),
            vmem_limit_bytes=vmem_limit,
        ),
        cost_estimate=cost,
    )(x2d, w2d)

    return out.reshape(orig_shape)


class MistralRMSNorm:
    """JAX/Pallas equivalent of the PyTorch MistralRMSNorm module."""

    def __init__(self, hidden_size, eps=1e-6):
        # nn.Parameter(torch.ones(hidden_size)) -> deterministic ones init
        self.weight = jnp.ones((hidden_size,), dtype=jnp.float32)
        self.variance_epsilon = eps

    def __call__(self, hidden_states):
        return rms_norm(hidden_states, self.weight, self.variance_epsilon)


def _reference_rms_norm(x, w, eps):
    x32 = x.astype(jnp.float32)
    var = jnp.mean(x32 * x32, axis=-1, keepdims=True)
    normed = (x32 * jax.lax.rsqrt(var + eps)).astype(x.dtype)
    return w.astype(x.dtype) * normed


if __name__ == "__main__":
    batch, seq, hidden = 2, 8, 32
    key = jax.random.PRNGKey(0)
    k_x, k_w, k_r = jax.random.split(key, 3)

    module = MistralRMSNorm(hidden, eps=1e-6)
    # Non-trivial but deterministic weight to exercise the scale path.
    module.weight = 1.0 + 0.01 * jax.random.normal(k_w, (hidden,), dtype=jnp.float32)

    # Case 1: even grid (rows divisible by the block).
    x = jax.random.normal(k_x, (batch, seq, hidden), dtype=jnp.float32)
    out = module(x)
    jax.block_until_ready(out)
    ref = _reference_rms_norm(x, module.weight, module.variance_epsilon)
    assert out.shape == x.shape and out.dtype == x.dtype
    assert jnp.allclose(out, ref, atol=1e-5, rtol=1e-5)

    # Case 2: ragged last block (rows not a multiple of the block) -- no
    # wrapper pad/slice, Pallas discards out-of-bounds boundary writes.
    x2 = jax.random.normal(k_r, (3, 5, hidden), dtype=jnp.float32)
    out2 = module(x2)
    jax.block_until_ready(out2)
    ref2 = _reference_rms_norm(x2, module.weight, module.variance_epsilon)
    assert out2.shape == x2.shape and out2.dtype == x2.dtype
    assert jnp.allclose(out2, ref2, atol=1e-5, rtol=1e-5)

    print("KERNEL_OK")
</pallas_src>

<mosaic_0001>
module attributes {stable_mosaic.version = 11 : i64} {
  func.func @_rms_norm_kernel(%arg0: i32, %arg1: memref<8x32xf32, #tpu.memory_space<vmem>>, %arg2: memref<1x32xf32, #tpu.memory_space<vmem>>, %arg3: memref<8x32xf32, #tpu.memory_space<vmem>>) attributes {dimension_semantics = [#tpu.dimension_semantics<parallel>], iteration_bounds = array<i64: 2>, scalar_prefetch = 0 : i64, scratch_operands = 0 : i64, tpu.core_type = #tpu.core_type<tc>, window_params = [{transform_indices = @transform_0, window_bounds = array<i64: 8, 32>}, {pipeline_mode = #tpu.pipeline_mode<synchronous>, transform_indices = @transform_1, window_bounds = array<i64: 1, 32>}, {transform_indices = @transform_2, window_bounds = array<i64: 8, 32>}]} {
    %c0 = arith.constant 0 : index
    %c0_0 = arith.constant 0 : index
    %0 = vector.load %arg2[%c0, %c0_0] : memref<1x32xf32, #tpu.memory_space<vmem>>, vector<1x32xf32>
    %c0_1 = arith.constant 0 : index
    %c0_2 = arith.constant 0 : index
    %1 = vector.load %arg1[%c0_1, %c0_2] : memref<8x32xf32, #tpu.memory_space<vmem>>, vector<8x32xf32>
    %2 = arith.mulf %1, %1 : vector<8x32xf32>
    %cst = arith.constant dense<0.000000e+00> : vector<8xf32>
    %3 = vector.multi_reduction <add>, %2, %cst [1] : vector<8x32xf32> to vector<8xf32>
    %4 = vector.shape_cast %3 : vector<8xf32> to vector<8x1xf32>
    %cst_3 = arith.constant 3.125000e-02 : f32
    %5 = vector.broadcast %cst_3 : f32 to vector<8x1xf32>
    %6 = arith.mulf %4, %5 : vector<8x1xf32>
    %cst_4 = arith.constant 9.99999997E-7 : f32
    %7 = vector.broadcast %cst_4 : f32 to vector<8x1xf32>
    %8 = arith.addf %6, %7 : vector<8x1xf32>
    %9 = math.rsqrt %8 : vector<8x1xf32>
    %10 = vector.broadcast %9 : vector<8x1xf32> to vector<8x32xf32>
    %11 = arith.mulf %1, %10 : vector<8x32xf32>
    %12 = vector.broadcast %0 : vector<1x32xf32> to vector<8x32xf32>
    %13 = arith.mulf %12, %11 : vector<8x32xf32>
    %c0_5 = arith.constant 0 : index
    %c0_6 = arith.constant 0 : index
    %14 = vector.load %arg3[%c0_5, %c0_6] : memref<8x32xf32, #tpu.memory_space<vmem>>, vector<8x32xf32>
    tpu.vector_store %arg3[%c0_5, %c0_6], %13 {strides = array<i32>} : memref<8x32xf32, #tpu.memory_space<vmem>>, vector<8x32xf32>,
    return
  }
  func.func @transform_0(%arg0: i32) -> (i32, i32) {
    %c0_i32 = arith.constant 0 : i32
    %c0_i32_0 = arith.constant 0 : i32
    return %arg0, %c0_i32 : i32, i32
  }
  func.func @transform_1(%arg0: i32) -> (i32, i32) {
    %c0_i32 = arith.constant 0 : i32
    %c0_i32_0 = arith.constant 0 : i32
    %c0_i32_1 = arith.constant 0 : i32
    return %c0_i32, %c0_i32_0 : i32, i32
  }
  func.func @transform_2(%arg0: i32) -> (i32, i32) {
    %c0_i32 = arith.constant 0 : i32
    %c0_i32_0 = arith.constant 0 : i32
    return %arg0, %c0_i32 : i32, i32
  }
}

</mosaic_0001>

<bundles_post_ra>
// kernel: tpu_custom_call.1
= control target key start
LH: loop header
LB: loop body
LE: loop exit
PB: predicated region body
PF: predicated region fallthrough
CT: control target
= control target key end

     0   :  { %7 = vsyncpa [#allocation3], 0  ;;  %s659_s0 = inlined_call_operand.hbm [shape: f32[16,32], index: 0, kind: input, shape index: {}]   ;;  %s660_s1 = inlined_call_operand.hbm [shape: f32[1,32], index: 1, kind: input, shape index: {}]   ;;  %s661_s2 = inlined_call_operand.hbm [shape: f32[16,32], index: 2, kind: output, shape index: {}]  }
   0x1   :  { %9 = vsyncpa [#allocation3 + $0x1], 0 }
   0x2   :  { %10 = vsyncpa [#allocation6], 0 }
   0x3   :  { %11 = vsyncpa [#allocation4], 0 }
   0x4   :  { %13 = vsyncpa [#allocation4 + $0x1], 0  ;;  %s519_s9 = smov 0   ;;  %s521_s10 = smov 0  }
   0x5   :  { %s523_s11 = smov 0   ;;  %s525_s12 = smov 0  }
   0x6 LB: > { %s540_s13 = sadd.s32 4294967295, %s501_s12   ;;  %s297_s14 = sadd.s32 4294967294, %s501_s12   ;;  %s501_s12 = sphi %s525_s12, %s671_s12   ;;  %s497_s11 = sphi %s523_s11, %s670_s11   ;;  %s493_s10 = sphi %s521_s10, %s669_s10   ;;  %s489_s9 = sphi %s519_s9, %s668_s9  }
   0x7   : > { %p39_p0 = scmp.ne.s32.totalorder %s493_s10, %s489_s9  ;;  %p40_p1 = scmp.eq.s32.totalorder %s540_s13, 0 }
   0x8   : > { %p84_p2 = scmp.eq.s32.totalorder %s540_s13, 1  ;;  %p90_p3 = scmp.eq.s32.totalorder %s297_s14, 1 }
   0x9   : > { %p549_p4 = por %p40_p1, %p39_p0  ;;  %p298_p5 = scmp.ge.s32.totalorder %s501_s12, 1 }
   0xa   : > { %p554_p6 = por %p90_p3, %p39_p0  ;;  %p97_p7 = scmp.lt.s32.totalorder %s501_s12, 3 }
   0xb   : > { %s109_s19 = sshll.u32 %s660_s1, 4  ;;  %s503_s21 = smov [#allocation5]   ;;  %s110_s19 = int_to_ptr.hbm [resolvable:$true] %s109_s19 }
   0xc   : > { %p562_p8 = pnand %p298_p5, %p97_p7  ;;  %s111_s22 = sshll.u32 %s503_s21, 4  ;;  %s112_s22 = int_to_ptr.vmem [resolvable:$true] %s111_s22 }
   0xd   : > { %s572_s23 = sadd.s32 1, %s501_s12   ;;  %s26_s24 = sadd.s32 1, %s497_s11 }
   0xe   : > { %p319_p10 = pneg %p562_p8  ;;  %s23_s25 = ssub.s32 %s501_s12, %s572_s23 }
   0xf   : > { %p24_p12 = scmp.eq.s32.totalorder %s23_s25, 0  ;;  %p33_p13 = scmp.ne.s32.totalorder %s497_s11, %s493_s10 }
  0x10   : > { %p320_p11 = pnand %p319_p10, %p40_p1  ;;  %p34_p0 = scmp.eq.s32.totalorder %s501_s12, 0 }
  0x11   : > { %s581_s26 = scalar_select %p24_p12, %s497_s11, %s26_s24  }
  0x12   : > { %322 = dma.hbm_to_vmem [thread:$0]  (!%p320_p11), %s110_s19, 16, %s112_s22, [#allocation6]  }
  0x13   : > { %p585_p3 = por %p84_p2, %p33_p13  ;;  %p332_p5 = scmp.lt.s32.totalorder %s501_s12, 2 }
  0x14   : > { %s122_s28 = sand.u32 1, %s497_s11   ;;  %s302_s29 = sshll.u32 %s501_s12, 3 }
  0x15   : > { %p35_p7 = por %p34_p0, %p33_p13  ;;  %s301_s30 = sshll.u32 %s122_s28, 3 }
  0x16   : > { %s130_s5 = scalar_lea.hbm %s659_s0, %s302_s29  ;;  %s126_s7 = scalar_lea.vmem [#allocation2], %s301_s30 }
  0x17   : > { %s132_s6 = sshll.u32 %s130_s5, 4  ;;  %s134_s8 = sshll.u32 %s126_s7, 4  ;;  %s133_s6 = int_to_ptr.hbm [resolvable:$true] %s132_s6  ;;  %s135_s8 = int_to_ptr.vmem [resolvable:$true] %s134_s8 }
  0x18   : > { %p595_p10 = pnand %p332_p5, %p35_p7  ;;  %s123_s17 = scalar_lea.sflag [#allocation3], %s122_s28 }
  0x19   : > { %s401_s18 = sshra.s32 %s133_s6, 4  ;;  %s408_s24 = scalar_lea.hbm %s659_s0, 16  ;;  %s402_s18 = int_to_ptr.hbm [resolvable:$true] %s401_s18 }
  0x1a   : > { %s403_s19 = scalar_lea.hbm %s402_s18, 8  ;;  %p405_p11 = pneg %p595_p10 }
  0x1b   : > { %p404_p2 = scmp.ne.s32.totalorder %s402_s18, %s403_s19  ;;  %p409_p0 = scmp.lt.s32.totalorder %s402_s18, %s659_s0 }
  0x1c   : > { %p410_p5 = scmp.lt.s32.totalorder %s408_s24, %s403_s19 }
  0x1d   : > { %p406_p12 = pnand %p405_p11, %p404_p2 }
  0x1e   : > { %p411_p7 = por %p410_p5, %p409_p0 }
  0x1f   : > { %p407_p13 = pneg %p406_p12 }
  0x21   : > { %p412_p9 = pnand %p411_p7, %p407_p13 }
  0x23   : > { %415 = shalt.err (!%p412_p9)
}
  0x24   : > { %326 = dma.hbm_to_vmem [thread:$0]  (!%p595_p10), %s133_s6, 128, %s135_s8, %s123_s17  }
  0x25   : > { %143 = sbr.rel (%p562_p8) target bundleno = 194 (0xc2), region = 28  ;;  %s612_s28 = sand.u32 (!%p562_p8), 1, %s493_s10  }
  0x26   : > { %s304_s30 = sshll.u32 (!%p562_p8), %s612_s28, 3  ;;  %s146_s3 = scalar_lea.sflag (!%p562_p8), [#allocation3], %s612_s28 }
  0x27   : > { %s149_s4 = scalar_lea.vmem (!%p562_p8), [#allocation2], %s304_s30 }
  0x2a   : > { %476 = dma.done.wait (%p549_p4), %s146_s3, 128  }
  0x2b   : > { %478 = vsyncadd (%p549_p4), %s146_s3, 4294967168 }
  0x2c   : > { %480 = dma.done.wait (%p40_p1), [#allocation6], 16  }
  0x2d   : > { %482 = vsyncadd (%p40_p1), [#allocation6], 4294967280  ;;  %v177_v0 = vld [vmem:[%s149_s4] sm:$0xff]  ;;  %vm179_vm0 = vcmask 261120   ;;  %s308_s15 = sshll.u32 %s540_s13, 3  ;;  %s175_s7 = scalar_lea.vmem [#allocation7], %s304_s30 }
  0x2e   : > { %v178_v1 = vmul.f32 %v177_v0, %v177_v0  ;;  %s212_s6 = scalar_lea.hbm %s661_s2, %s308_s15  ;;  %v368_v12 = vld [vmem:[#allocation5] ss:$0 sm:$0xff]  ;;  %s214_s8 = sshll.u32 %s175_s7, 4  ;;  %s215_s8 = int_to_ptr.vmem [resolvable:$true] %s214_s8 }
  0x2f   : > { %s216_s14 = sshll.u32 %s212_s6, 4  ;;  %s202_s13 = scalar_lea.sflag [#allocation4], %s612_s28  ;;  %s217_s14 = int_to_ptr.hbm [resolvable:$true] %s216_s14 }
  0x30   : > { %v180_v2 = vsel %vm179_vm0, %v178_v1, 0.0  ;;  %s445_s17 = sshra.s32 %s217_s14, 4  ;;  %s451_s22 = scalar_lea.hbm %s661_s2, 16  ;;  %s446_s17 = int_to_ptr.hbm [resolvable:$true] %s445_s17 }
  0x31   : > { %181 = vadd.xlane.f32.xlu0 %v180_v2  ;;  %s447_s18 = scalar_lea.hbm %s446_s17, 8  ;;  %p452_p9 = scmp.lt.s32.totalorder %s446_s17, %s661_s2 }
  0x32   : > { %p448_p1 = scmp.ne.s32.totalorder %s446_s17, %s447_s18  ;;  %p453_p10 = scmp.lt.s32.totalorder %s451_s22, %s447_s18 }
  0x34   : > { %p449_p4 = pnand %p448_p1, %p585_p3  ;;  %p454_p2 = por %p453_p10, %p452_p9 }
  0x36   : > { %p450_p8 = pneg %p449_p4 }
  0x38   : > { %p455_p11 = pnand %p454_p2, %p450_p8 }
  0xa4   : > { %v182_v3 = vpop.xlane.xlu0 %181 }
  0xa5   : > { %v183_v4 = vmul.f32 0.03125, %v182_v3 }
  0xa7   : > { %v184_v5 = vadd.f32 1e-06, %v183_v4 }
  0xa9   : > { %369 = vrsqrt.f32 %v184_v5  ;;  %vm191_vm2 = vweird.f32 %v184_v5 }
  0xaf   : > { %v370_v6 = vpop.eup %369 }
  0xb0   : > { %v186_v7 = vmul.f32 %v370_v6, %v184_v5  ;;  %vm192_vm1 = vweird.f32 %v370_v6 }
  0xb1   : > { %vm193_vm3 = vmor %vm191_vm2, %vm192_vm1 }
  0xb2   : > { %v187_v8 = vmul.f32 %v370_v6, %v186_v7 }
  0xb4   : > { %v188_v9 = vmul.f32 0.5, %v187_v8 }
  0xb6   : > { %v189_v10 = vsub.f32 1.5, %v188_v9 }
  0xb8   : > { %v190_v11 = vmul.f32 %v370_v6, %v189_v10 }
  0xba   : > { %v194_v13 = vsel %vm193_vm3, %v370_v6, %v190_v11 }
  0xbb   : > { %v195_v14 = vmul.f32 %v194_v13, %v177_v0 }
  0xbd   : > { %v199_v15 = vmul.f32 %v368_v12, %v195_v14 }
  0xbf   : > { %200 = vst.msk [vmem:[%s175_s7] sm:$0xff] %vm179_vm0, %v199_v15 }
  0xc0   : > { %458 = shalt.err (!%p455_p11)
}
  0xc1   : > { %317 = dma.vmem_to_hbm [thread:$0]  (%p585_p3), %s215_s8, 128, %s217_s14, %s202_s13  }
  0xc2 PF: > { %s228_s29 = sand.u32 1, %s489_s9   ;;  %p667_p12 = scmp.ge.s32.totalorder %s501_s12, 2 }
  0xc3   : > { %s229_s28 = scalar_lea.sflag [#allocation4], %s228_s29 }
  0xc4   : > { %p328_p13 = pnand %p667_p12, %p554_p6 }
  0xc6   : > { %p329_p0 = pneg %p328_p13 }
  0xc8   : > { %484 = dma.done.wait (%p329_p0), %s229_s28, 128  }
  0xc9   : > { %486 = vsyncadd (%p329_p0), %s229_s28, 4294967168  ;;  %p16_p5 = scmp.ge.s32.totalorder %s572_s23, 4   ;;  %s668_s9 = smov %s493_s10 }
  0xca   : > { %s669_s10 = smov %s497_s11  ;;  %s670_s11 = smov %s581_s26 }
  0xcb   : > { %s671_s12 = smov %s572_s23  ;;  %18 = sbr.rel (!%p16_p5) target bundleno = 6 (0x6), region = 77 }
  0xd0   :  { %235 = vsyncpa [#allocation3], 1 }
  0xd1   :  { %237 = vsyncpa [#allocation3 + $0x1], 1 }
  0xd2   :  { %238 = vsyncpa [#allocation6], 1 }
  0xd3   :  { %239 = vsyncpa [#allocation4], 1 }
  0xd4   :  { %241 = vsyncpa [#allocation4 + $0x1], 1 }

</bundles_post_ra>
